<compile_context>
chip_gen: v6e
topology: v6e:2x2x1
jax: 0.10.0
libtpu: 0.0.40
codegen_flags: <defaults>
</compile_context>

<pallas_src>
import jax
import jax.numpy as jnp
from jax.experimental import pallas as pl
from jax.experimental.pallas import tpu as pltpu

EMB = 7          # embedding_size
HID = 64         # hidden width of actor / critic
ACT = 4          # action_space
PACK = 16        # packed input rows:  [x(7) | 1 | state_dist(4) | budget | pad(3)]
OUTW = 8         # packed output rows: [dist(4) | value | value pad(3)]
LANES = 128
MAX_TB = 4096    # default cap on the batch (lane) tile


# ----------------------------- Pallas kernel --------------------------------
def _acmodel_adversary_kernel(p_ref, w1_ref, w2_ref, b2_ref, out_ref):
    p = p_ref[...]                                   # (PACK, TB)
    x8 = p[0:EMB + 1, :]                             # (8, TB) features + bias-1 row
    sd = p[EMB + 1:EMB + 1 + ACT, :]                 # (4, TB) state_dist
    budget = p[EMB + 1 + ACT:EMB + 2 + ACT, :]       # (1, TB) remaining budget

    # fused layer 1: [actor | critic] Linear(7,64)+Tanh, biases folded into x8's 1-row
    h = jnp.tanh(jnp.dot(w1_ref[...], x8,
                         preferred_element_type=jnp.float32))       # (128, TB)

    # fused block-diagonal layer 2: rows 0..3 actor logits, row 4 critic value
    y = jnp.dot(w2_ref[...], h,
                preferred_element_type=jnp.float32) + b2_ref[...]   # (8, TB)
    logits = y[0:ACT, :]                             # (4, TB)
    value = y[ACT:ACT + 1, :]                        # (1, TB)

    # softmax fused with rescale: pert = softmax(l)/sum(sd*softmax(l)) = e/sum(sd*e)
    m = jnp.max(logits, axis=0, keepdims=True)
    e = jnp.exp(logits - m)
    diviseur = jnp.sum(sd * e, axis=0, keepdims=True)
    pert = e / diviseur                              # exact divide (no approx recip)

    # apply_budget_constraint
    max_pert = jnp.max(pert, axis=0, keepdims=True)
    over_budget = max_pert >= budget
    empty_budget = (budget - 1e-6) < 1.0
    lam = jnp.where(over_budget,
                    (max_pert - budget) / (max_pert - 1.0 + 1e-6),
                    0.0)
    lam = jnp.where(empty_budget, 1.0, lam)          # empty-budget overrides
    pert = lam + (1.0 - lam) * pert
    new_dist = pert * sd                             # (4, TB)

    # Categorical(probs=new_dist) stores the normalized probabilities.
    dist = new_dist / jnp.sum(new_dist, axis=0, keepdims=True)

    # one lane-dense store: rows 0..3 dist, rows 4..7 value (broadcast)
    out_ref[...] = jnp.concatenate(
        [dist, jnp.broadcast_to(value, (OUTW - ACT, dist.shape[1]))], axis=0)


# --------------------------- parameter fusion --------------------------------
def fuse_params(params):
    """Build the fused kernel weights ONCE per parameter set (hoisted per review)."""
    (w1a, b1a), (w2a, b2a), (w1c, b1c), (w2c, b2c) = params

    # layer-1: (2*HID, EMB+1); column EMB carries the biases (paired with the 1-row).
    w1f = jnp.zeros((2 * HID, EMB + 1), jnp.float32)
    w1f = w1f.at[:HID, :EMB].set(w1a)
    w1f = w1f.at[:HID, EMB].set(b1a)
    w1f = w1f.at[HID:, :EMB].set(w1c)
    w1f = w1f.at[HID:, EMB].set(b1c)

    # layer-2: block-diagonal (OUTW, 2*HID) + bias column (OUTW, 1).
    w2f = jnp.zeros((OUTW, 2 * HID), jnp.float32)
    w2f = w2f.at[:ACT, :HID].set(w2a)
    w2f = w2f.at[ACT, HID:].set(w2c[0])
    b2f = jnp.zeros((OUTW, 1), jnp.float32)
    b2f = b2f.at[:ACT, 0].set(b2a)
    b2f = b2f.at[ACT, 0].set(b2c[0])
    return w1f, w2f, b2f


# ------------------------------- wrapper --------------------------------------
def _round_up(n, m):
    return pl.cdiv(n, m) * m


def acmodel_adversary_forward(input_info, state_dist, budgets, fused_params, *, tb=None):
    """Returns (dist_probs, value): probs of the returned Categorical, squeezed critic."""
    w1f, w2f, b2f = fused_params
    B = input_info.shape[0]
    x = input_info.reshape(B, -1).astype(jnp.float32)
    assert x.shape[1] == EMB
    sd = state_dist.astype(jnp.float32).reshape(B, ACT)
    bud = budgets.astype(jnp.float32).reshape(B, 1)

    if tb is None:
        tb = min(int(_round_up(B, LANES)), MAX_TB)
    assert tb % LANES == 0, "batch tile must be a multiple of 128 lanes"
    Bp = int(_round_up(B, tb))

    # one-pass pack: (B,16) concat -> transpose -> (16,B); batch on the lane axis.
    packed = jnp.concatenate(
        [x,
         jnp.ones((B, 1), jnp.float32),                                   # bias-1 row
         sd,
         bud,
         jnp.zeros((B, PACK - (EMB + 2 + ACT)), jnp.float32)], axis=1).T  # (16, B)

    if Bp > B:   # benign padding columns (never read back, keep all math finite)
        pad_col = jnp.concatenate(
            [jnp.zeros((EMB,), jnp.float32),
             jnp.ones((1,), jnp.float32),
             jnp.full((ACT,), 0.25, jnp.float32),
             jnp.full((1,), 2.0, jnp.float32),
             jnp.zeros((PACK - (EMB + 2 + ACT),), jnp.float32)])
        packed = jnp.concatenate(
            [packed, jnp.broadcast_to(pad_col[:, None], (PACK, Bp - B))], axis=1)

    out = pl.pallas_call(
        _acmodel_adversary_kernel,
        out_shape=jax.ShapeDtypeStruct((OUTW, Bp), jnp.float32),
        grid=(Bp // tb,),
        in_specs=[
            pl.BlockSpec((PACK, tb), lambda i: (0, i)),          # packed inputs
            pl.BlockSpec((2 * HID, EMB + 1), lambda i: (0, 0)),  # fused W1 (+biases)
            pl.BlockSpec((OUTW, 2 * HID), lambda i: (0, 0)),     # fused block-diag W2
            pl.BlockSpec((OUTW, 1), lambda i: (0, 0)),           # fused b2
        ],
        out_specs=pl.BlockSpec((OUTW, tb), lambda i: (0, i)),
        compiler_params=pltpu.CompilerParams(
            dimension_semantics=("parallel",),
            vmem_limit_bytes=32 * 1024 * 1024),
    )(packed, w1f, w2f, b2f)

    dist_probs = out[:ACT, :B].T        # (B, 4)
    value = out[ACT, :B]                # (B,)
    return dist_probs, value


# ------------------------- parameter init (init_params) ----------------------
def _init_linear(key, out_f, in_f):
    # weight ~ N(0,1), each row normalized to unit L2 norm; bias = 0
    w = jax.random.normal(key, (out_f, in_f), dtype=jnp.float32)
    w = w / jnp.sqrt(jnp.sum(w * w, axis=1, keepdims=True))
    b = jnp.zeros((out_f,), jnp.float32)
    return w, b


def make_params(key):
    k1, k2, k3, k4 = jax.random.split(key, 4)
    return (_init_linear(k1, HID, EMB), _init_linear(k2, ACT, HID),
            _init_linear(k3, HID, EMB), _init_linear(k4, 1, HID))


# ------------------------------ pure-JAX reference ---------------------------
def reference_forward(input_info, state_dist, budgets, params):
    (w1a, b1a), (w2a, b2a), (w1c, b1c), (w2c, b2c) = params
    x = input_info.reshape(input_info.shape[0], -1)
    h = jnp.tanh(x @ w1a.T + b1a)
    logits = h @ w2a.T + b2a
    probs = jax.nn.softmax(logits, axis=1)
    diviseur = jnp.sum(state_dist * probs, axis=1, keepdims=True)
    pert = probs / diviseur
    max_pert = jnp.max(pert, axis=-1, keepdims=True)
    over = max_pert >= budgets
    empty = (budgets - 1e-6) < 1.0
    lam = jnp.where(over, (max_pert - budgets) / (max_pert - 1.0 + 1e-6), 0.0)
    lam = jnp.where(empty, 1.0, lam)
    pert = lam + (1.0 - lam) * pert
    new_dist = pert * state_dist
    dist_probs = new_dist / jnp.sum(new_dist, axis=-1, keepdims=True)
    hc = jnp.tanh(x @ w1c.T + b1c)
    value = (hc @ w2c.T + b2c)[:, 0]
    return dist_probs, value


def _check(B, key, params, fused, msg, tb=None):
    kx, ks, kb = jax.random.split(key, 3)
    input_info = jax.random.normal(kx, (B, EMB), dtype=jnp.float32)
    state_dist = jax.nn.softmax(
        jax.random.normal(ks, (B, ACT), dtype=jnp.float32), axis=1)
    budgets = jax.random.uniform(kb, (B, 1), dtype=jnp.float32,
                                 minval=0.5, maxval=3.0)

    dist_probs, value = acmodel_adversary_forward(
        input_info, state_dist, budgets, fused, tb=tb)
    jax.block_until_ready((dist_probs, value))

    ref_dist, ref_value = reference_forward(input_info, state_dist, budgets, params)
    assert jnp.allclose(dist_probs, ref_dist, rtol=5e-3, atol=2e-4), \
        f"dist mismatch vs reference ({msg})"
    assert jnp.allclose(value, ref_value, rtol=1e-3, atol=2e-4), \
        f"value mismatch vs reference ({msg})"


# ---------------------------------- main --------------------------------------
if __name__ == "__main__":
    key = jax.random.PRNGKey(0)
    kp, k_small, k_tiled = jax.random.split(key, 3)
    params = make_params(kp)
    fused = fuse_params(params)   # fused weights built once, reused per call

    # small batch: one 128-lane tile (batch padded 8 -> 128)
    _check(8, k_small, params, fused, "B=8 single-tile")
    # multi-tile path: 3 tiles of 256 lanes with batch padding (600 -> 768)
    _check(600, k_tiled, params, fused, "B=600 tiled (tb=256)", tb=256)

    # TODO(synk): the torch Categorical distribution object itself has no Pallas
    # equivalent; the kernel returns its normalized probs (and the critic value).
    print("KERNEL_OK")
</pallas_src>

<mosaic_0001>
module attributes {stable_mosaic.version = 11 : i64} {
  func.func @_acmodel_adversary_kernel(%arg0: i32, %arg1: memref<16x128xf32, #tpu.memory_space<vmem>>, %arg2: memref<128x8xf32, #tpu.memory_space<vmem>>, %arg3: memref<8x128xf32, #tpu.memory_space<vmem>>, %arg4: memref<8x1xf32, #tpu.memory_space<vmem>>, %arg5: memref<8x128xf32, #tpu.memory_space<vmem>>) attributes {dimension_semantics = [#tpu.dimension_semantics<parallel>], iteration_bounds = array<i64: 1>, scalar_prefetch = 0 : i64, scratch_operands = 0 : i64, tpu.core_type = #tpu.core_type<tc>, window_params = [{transform_indices = @transform_0, window_bounds = array<i64: 16, 128>}, {pipeline_mode = #tpu.pipeline_mode<synchronous>, transform_indices = @transform_1, window_bounds = array<i64: 128, 8>}, {pipeline_mode = #tpu.pipeline_mode<synchronous>, transform_indices = @transform_2, window_bounds = array<i64: 8, 128>}, {pipeline_mode = #tpu.pipeline_mode<synchronous>, transform_indices = @transform_3, window_bounds = array<i64: 8, 1>}, {transform_indices = @transform_4, window_bounds = array<i64: 8, 128>}]} {
    %c0 = arith.constant 0 : index
    %c0_0 = arith.constant 0 : index
    %0 = vector.load %arg1[%c0, %c0_0] : memref<16x128xf32, #tpu.memory_space<vmem>>, vector<16x128xf32>
    %1 = vector.extract_strided_slice %0 {offsets = [0, 0], sizes = [8, 128], strides = [1, 1]} : vector<16x128xf32> to vector<8x128xf32>
    %2 = vector.extract_strided_slice %0 {offsets = [8, 0], sizes = [4, 128], strides = [1, 1]} : vector<16x128xf32> to vector<4x128xf32>
    %3 = vector.extract_strided_slice %0 {offsets = [12, 0], sizes = [1, 128], strides = [1, 1]} : vector<16x128xf32> to vector<1x128xf32>
    %c0_1 = arith.constant 0 : index
    %c0_2 = arith.constant 0 : index
    %4 = vector.load %arg2[%c0_1, %c0_2] : memref<128x8xf32, #tpu.memory_space<vmem>>, vector<128x8xf32>
    %cst = arith.constant dense<0.000000e+00> : vector<128x128xf32>
    %5 = tpu.matmul %4, %1, %cst {dimension_numbers = #tpu.dot_dimension_numbers<[1], [0], [0], [1], [0, 0, 1, 1], [], []>} : vector<128x8xf32>, vector<8x128xf32>, vector<128x128xf32> -> vector<128x128xf32>
    %6 = math.tanh %5 : vector<128x128xf32>
    %c0_3 = arith.constant 0 : index
    %c0_4 = arith.constant 0 : index
    %7 = vector.load %arg3[%c0_3, %c0_4] : memref<8x128xf32, #tpu.memory_space<vmem>>, vector<8x128xf32>
    %cst_5 = arith.constant dense<0.000000e+00> : vector<8x128xf32>
    %8 = tpu.matmul %7, %6, %cst_5 {dimension_numbers = #tpu.dot_dimension_numbers<[1], [0], [0], [1], [0, 0, 1, 1], [], []>} : vector<8x128xf32>, vector<128x128xf32>, vector<8x128xf32> -> vector<8x128xf32>
    %c0_6 = arith.constant 0 : index
    %c0_7 = arith.constant 0 : index
    %9 = vector.load %arg4[%c0_6, %c0_7] : memref<8x1xf32, #tpu.memory_space<vmem>>, vector<8x1xf32>
    %10 = vector.broadcast %9 : vector<8x1xf32> to vector<8x128xf32>
    %11 = arith.addf %8, %10 : vector<8x128xf32>
    %12 = vector.extract_strided_slice %11 {offsets = [0, 0], sizes = [4, 128], strides = [1, 1]} : vector<8x128xf32> to vector<4x128xf32>
    %13 = vector.extract_strided_slice %11 {offsets = [4, 0], sizes = [1, 128], strides = [1, 1]} : vector<8x128xf32> to vector<1x128xf32>
    %cst_8 = arith.constant dense<0xFF800000> : vector<128xf32>
    %14 = vector.multi_reduction <maximumf>, %12, %cst_8 [0] : vector<4x128xf32> to vector<128xf32>
    %15 = vector.shape_cast %14 : vector<128xf32> to vector<1x128xf32>
    %16 = vector.broadcast %15 : vector<1x128xf32> to vector<4x128xf32>
    %17 = arith.subf %12, %16 : vector<4x128xf32>
    %18 = math.exp %17 : vector<4x128xf32>
    %19 = arith.mulf %2, %18 : vector<4x128xf32>
    %cst_9 = arith.constant dense<0.000000e+00> : vector<128xf32>
    %20 = vector.multi_reduction <add>, %19, %cst_9 [0] : vector<4x128xf32> to vector<128xf32>
    %21 = vector.shape_cast %20 : vector<128xf32> to vector<1x128xf32>
    %22 = vector.broadcast %21 : vector<1x128xf32> to vector<4x128xf32>
    %23 = arith.divf %18, %22 : vector<4x128xf32>
    %cst_10 = arith.constant dense<0xFF800000> : vector<128xf32>
    %24 = vector.multi_reduction <maximumf>, %23, %cst_10 [0] : vector<4x128xf32> to vector<128xf32>
    %25 = vector.shape_cast %24 : vector<128xf32> to vector<1x128xf32>
    %26 = arith.cmpf oge, %25, %3 : vector<1x128xf32>
    %cst_11 = arith.constant 9.99999997E-7 : f32
    %27 = vector.broadcast %cst_11 : f32 to vector<1x128xf32>
    %28 = arith.subf %3, %27 : vector<1x128xf32>
    %cst_12 = arith.constant 1.000000e+00 : f32
    %29 = vector.broadcast %cst_12 : f32 to vector<1x128xf32>
    %30 = arith.cmpf olt, %28, %29 : vector<1x128xf32>
    %31 = arith.subf %25, %3 : vector<1x128xf32>
    %cst_13 = arith.constant 1.000000e+00 : f32
    %32 = vector.broadcast %cst_13 : f32 to vector<1x128xf32>
    %33 = arith.subf %25, %32 : vector<1x128xf32>
    %cst_14 = arith.constant 9.99999997E-7 : f32
    %34 = vector.broadcast %cst_14 : f32 to vector<1x128xf32>
    %35 = arith.addf %33, %34 : vector<1x128xf32>
    %36 = arith.divf %31, %35 : vector<1x128xf32>
    %cst_15 = arith.constant 0.000000e+00 : f32
    %37 = vector.broadcast %cst_15 : f32 to vector<1x128xf32>
    %38 = arith.select %26, %36, %37 : vector<1x128xi1>, vector<1x128xf32>
    %cst_16 = arith.constant 1.000000e+00 : f32
    %39 = vector.broadcast %cst_16 : f32 to vector<1x128xf32>
    %40 = arith.select %30, %39, %38 : vector<1x128xi1>, vector<1x128xf32>
    %cst_17 = arith.constant 1.000000e+00 : f32
    %41 = vector.broadcast %cst_17 : f32 to vector<1x128xf32>
    %42 = arith.subf %41, %40 : vector<1x128xf32>
    %43 = vector.broadcast %42 : vector<1x128xf32> to vector<4x128xf32>
    %44 = arith.mulf %43, %23 : vector<4x128xf32>
    %45 = vector.broadcast %40 : vector<1x128xf32> to vector<4x128xf32>
    %46 = arith.addf %45, %44 : vector<4x128xf32>
    %47 = arith.mulf %46, %2 : vector<4x128xf32>
    %cst_18 = arith.constant dense<0.000000e+00> : vector<128xf32>
    %48 = vector.multi_reduction <add>, %47, %cst_18 [0] : vector<4x128xf32> to vector<128xf32>
    %49 = vector.shape_cast %48 : vector<128xf32> to vector<1x128xf32>
    %50 = vector.broadcast %49 : vector<1x128xf32> to vector<4x128xf32>
    %51 = arith.divf %47, %50 : vector<4x128xf32>
    %52 = vector.shape_cast %13 : vector<1x128xf32> to vector<1x128xf32>
    %53 = vector.broadcast %52 : vector<1x128xf32> to vector<4x128xf32>
    %54 = tpu.concatenate %51, %53 in 0 : vector<4x128xf32>, vector<4x128xf32> -> vector<8x128xf32>
    %c0_19 = arith.constant 0 : index
    %c0_20 = arith.constant 0 : index
    %55 = vector.load %arg5[%c0_19, %c0_20] : memref<8x128xf32, #tpu.memory_space<vmem>>, vector<8x128xf32>
    tpu.vector_store %arg5[%c0_19, %c0_20], %54 {strides = array<i32>} : memref<8x128xf32, #tpu.memory_space<vmem>>, vector<8x128xf32>,
    return
  }
  func.func @transform_0(%arg0: i32) -> (i32, i32) {
    %c0_i32 = arith.constant 0 : i32
    %c0_i32_0 = arith.constant 0 : i32
    return %c0_i32, %arg0 : i32, i32
  }
  func.func @transform_1(%arg0: i32) -> (i32, i32) {
    %c0_i32 = arith.constant 0 : i32
    %c0_i32_0 = arith.constant 0 : i32
    %c0_i32_1 = arith.constant 0 : i32
    return %c0_i32, %c0_i32_0 : i32, i32
  }
  func.func @transform_2(%arg0: i32) -> (i32, i32) {
    %c0_i32 = arith.constant 0 : i32
    %c0_i32_0 = arith.constant 0 : i32
    %c0_i32_1 = arith.constant 0 : i32
    return %c0_i32, %c0_i32_0 : i32, i32
  }
  func.func @transform_3(%arg0: i32) -> (i32, i32) {
    %c0_i32 = arith.constant 0 : i32
    %c0_i32_0 = arith.constant 0 : i32
    %c0_i32_1 = arith.constant 0 : i32
    return %c0_i32, %c0_i32_0 : i32, i32
  }
  func.func @transform_4(%arg0: i32) -> (i32, i32) {
    %c0_i32 = arith.constant 0 : i32
    %c0_i32_0 = arith.constant 0 : i32
    return %c0_i32, %arg0 : i32, i32
  }
}

</mosaic_0001>

<bundles_post_ra>
// kernel: tpu_custom_call.1
= control target key start
LH: loop header
LB: loop body
LE: loop exit
PB: predicated region body
PF: predicated region fallthrough
CT: control target
= control target key end

     0   :  { %vm36_vm0 = vcmask 64512   ;;  %s717_s0 = inlined_call_operand.vmem [shape: f32[16,128], index: 0, kind: input, shape index: {}]   ;;  %s718_s1 = inlined_call_operand.vmem [shape: f32[128,8], index: 1, kind: input, shape index: {}]   ;;  %s719_s2 = inlined_call_operand.vmem [shape: f32[8,128], index: 2, kind: input, shape index: {}]   ;;  %s720_s3 = inlined_call_operand.vmem [shape: f32[8,1], index: 3, kind: input, shape index: {}]   ;;  %s721_s4 = inlined_call_operand.hbm [shape: f32[8,128], index: 4, kind: output, shape index: {}]  }
   0x1   :  { %v18_v0 = vld [vmem:[%s717_s0] sm:$0xff]  ;;  %v21_v2 = vld [vmem:[%s718_s1 + $0x8] sm:$0xff]  ;;  %v22_v3 = vld [vmem:[%s718_s1 + $0x10] sm:$0xff] }
   0x2   :  { %v20_v1 = vld [vmem:[%s718_s1] sm:$0xff]  ;;  %454 = vmatprep.subr.mxu0 %v18_v0  ;;  %v23_v4 = vld [vmem:[%s718_s1 + $0x18] sm:$0xff] }
   0x3   :  { %456 = vmatprep.mubr.msk.f32.mxu0 %vm36_vm0, %v20_v1  ;;  %455 = vmatpush3.msra.mxu0 %v18_v0  ;;  %v24_v5 = vld [vmem:[%s718_s1 + $0x20] sm:$0xff] }
   0x4   :  { %457 = vmatmul.mubr.msk.f32.vlgmr.msra.gmra.mxu0 %vm36_vm0, %v21_v2 }
   0x5   :  { %459 = vmatprep.mubr.msk.f32.mxu0 %vm36_vm0, %v22_v3 }
   0x6   :  { %9 = vsyncpa [#allocation3], 0  ;;  %v25_v6 = vld [vmem:[%s718_s1 + $0x28] sm:$0xff]  ;;  %v26_v7 = vld [vmem:[%s718_s1 + $0x30] sm:$0xff]  ;;  %v582_v17 = vmov 0.0   ;;  %vm583_vm1 = vmmov 0  }
   0x7   :  { %v27_v8 = vld [vmem:[%s718_s1 + $0x38] sm:$0xff]  ;;  %v28_v9 = vld [vmem:[%s718_s1 + $0x40] sm:$0xff]  ;;  %v29_v10 = vld [vmem:[%s718_s1 + $0x48] sm:$0xff]  ;;  %480 = vmatprep.subr.mxu1 %v582_v17  ;;  %512 = vmatprep.mubr.msk.f32.mxu1 %vm583_vm1, %v582_v17  ;;  %v584_v19 = vmov 0   ;;  %vm323_vm2 = vcmask 1043456  }
   0x8   :  { %460 = vmatmul.mubr.msk.f32.gmra.mxu0 %vm36_vm0, %v23_v4  ;;  %v30_v11 = vld [vmem:[%s718_s1 + $0x50] sm:$0xff]  ;;  %v31_v12 = vld [vmem:[%s718_s1 + $0x58] sm:$0xff]  ;;  %v32_v13 = vld [vmem:[%s718_s1 + $0x60] sm:$0xff]  ;;  %519 = vset.pattern.permute.xlu0 %v584_v19 }
   0x9   :  { %462 = vmatprep.mubr.msk.f32.mxu0 %vm36_vm0, %v24_v5  ;;  %v33_v14 = vld [vmem:[%s718_s1 + $0x68] sm:$0xff]  ;;  %v34_v15 = vld [vmem:[%s718_s1 + $0x70] sm:$0xff]  ;;  %v35_v16 = vld [vmem:[%s718_s1 + $0x78] sm:$0xff] }
   0xa   :  { %v247_v18 = vld [vmem:[%s720_s3] sm:$0xff]  ;;  %v19_v2 = vld [vmem:[%s717_s0 + $0x8] sm:$0xff]  ;;  %s585_s0 = smov [#allocation2]  }
   0xb   :  { %250 = vperm.xlu0 %519, %v247_v18   ;;  %v246_v51 = vld [vmem:[%s719_s2] sm:$0xff]  ;;  %s394_s26 = sshll.u32 %s585_s0, 4  ;;  %s395_s26 = int_to_ptr.vmem [resolvable:$true] %s394_s26 }
   0xc   :  { %463 = vmatmul.mubr.msk.f32.gmra.mxu0 %vm36_vm0, %v25_v6  ;;  %s560_s27 = scalar_lea.vmem %s395_s26, 128  ;;  %p565_p1 = scmp.lt.s32.totalorder %s395_s26, %s395_s26 }
   0xd   :  { %465 = vmatprep.mubr.msk.f32.mxu0 %vm36_vm0, %v26_v7  ;;  %p561_p0 = scmp.ne.s32.totalorder %s395_s26, %s560_s27  ;;  %p566_p2 = scmp.lt.s32.totalorder %s560_s27, %s560_s27 }
   0xf   :  { %p567_p3 = por %p566_p2, %p565_p1 }
  0x10   :  { %466 = vmatmul.mubr.msk.f32.gmra.mxu0 %vm36_vm0, %v27_v8 }
  0x11   :  { %468 = vmatprep.mubr.msk.f32.mxu0 %vm36_vm0, %v28_v9  ;;  %p568_p4 = pnand %p567_p3, %p561_p0 }
  0x14   :  { %469 = vmatmul.mubr.msk.f32.gmra.mxu0 %vm36_vm0, %v29_v10 }
  0x15   :  { %471 = vmatprep.mubr.msk.f32.mxu0 %vm36_vm0, %v30_v11 }
  0x18   :  { %472 = vmatmul.mubr.msk.f32.gmra.mxu0 %vm36_vm0, %v31_v12 }
  0x19   :  { %474 = vmatprep.mubr.msk.f32.mxu0 %vm36_vm0, %v32_v13 }
  0x1c   :  { %475 = vmatmul.mubr.msk.f32.gmra.mxu0 %vm36_vm0, %v33_v14 }
  0x1d   :  { %477 = vmatprep.mubr.msk.f32.mxu0 %vm36_vm0, %v34_v15 }
  0x20   :  { %478 = vmatmul.mubr.msk.f32.gmra.mxu0 %vm36_vm0, %v35_v16 }
  0x86   :  { %v251_v53 = vpop.permute.xlu0 %250 }
  0xc4   :  { %v458_v20 = vpop.f32.mrf.mxu0 }
  0xc6   :  { %v151_v21 = vpop.f32.mrf.mxu0 }
  0xc8   :  { %v461_v22 = vpop.f32.mrf.mxu0 }
  0xca   :  { %v161_v23 = vpop.f32.mrf.mxu0 }
  0xcc   :  { %v464_v24 = vpop.f32.mrf.mxu0 }
  0xce   :  { %v171_v25 = vpop.f32.mrf.mxu0 }
  0xd0   :  { %v467_v26 = vpop.f32.mrf.mxu0 }
  0xd2   :  { %v181_v27 = vpop.f32.mrf.mxu0 }
  0xd4   :  { %v470_v28 = vpop.f32.mrf.mxu0 }
  0xd6   :  { %v191_v29 = vpop.f32.mrf.mxu0 }
  0xd8   :  { %v473_v30 = vpop.f32.mrf.mxu0 }
  0xda   :  { %v201_v31 = vpop.f32.mrf.mxu0 }
  0xdc   :  { %v476_v32 = vpop.f32.mrf.mxu0 }
  0xde   :  { %v211_v33 = vpop.f32.mrf.mxu0 }
  0xe0   :  { %v479_v34 = vpop.f32.mrf.mxu0 }
  0xe1   :  { %520 = vtanh.f32 %v479_v34 }
  0xe2   :  { %v221_v35 = vpop.f32.mrf.mxu0 }
  0xe3   :  { %522 = vtanh.f32 %v221_v35 }
  0xe4   :  { %524 = vtanh.f32 %v476_v32 }
  0xe5   :  { %526 = vtanh.f32 %v211_v33 }
  0xe6   :  { %528 = vtanh.f32 %v473_v30 }
  0xe7   :  { %530 = vtanh.f32 %v201_v31 }
  0xe8   :  { %532 = vtanh.f32 %v470_v28 }
  0xe9   :  { %534 = vtanh.f32 %v191_v29 }
  0xea   :  { %536 = vtanh.f32 %v467_v26 }
  0xeb   :  { %538 = vtanh.f32 %v181_v27 }
  0xec   :  { %540 = vtanh.f32 %v464_v24  ;;  %v418_v24 = vadd.f32 -1e-06, %v19_v2 }
  0xed   :  { %542 = vtanh.f32 %v171_v25 }
  0xee   :  { %v521_v36 = vpop.eup %520  ;;  %544 = vtanh.f32 %v461_v22  ;;  %vm353_vm3 = vcmp.lt.f32.partialorder %v418_v24, 1.0 }
  0xef   :  { %481 = vmatpush3.msra.mxu1 %v521_v36  ;;  %546 = vtanh.f32 %v161_v23  ;;  %v362_v23 = vlaneseq }
  0xf0   :  { %v523_v37 = vpop.eup %522  ;;  %482 = vmatprep.subr.mxu1 %v582_v17  ;;  %548 = vtanh.f32 %v458_v20 }
  0xf1   :  { %483 = vmatpush3.msra.mxu1 %v523_v37  ;;  %v525_v38 = vpop.eup %524  ;;  %550 = vtanh.f32 %v151_v21  ;;  %v363_v27 = vshrl.u32 %v362_v23, 7 }
  0xf2   :  { %484 = vmatprep.subr.mxu1 %v582_v17  ;;  %v527_v39 = vpop.eup %526 }
  0xf3   :  { %485 = vmatpush3.msra.mxu1 %v525_v38  ;;  %v529_v40 = vpop.eup %528  ;;  %v364_v31 = vsub.s32 4, %v363_v27 }
  0xf4   :  { %486 = vmatprep.subr.mxu1 %v582_v17  ;;  %v531_v41 = vpop.eup %530 }
  0xf5   :  { %487 = vmatpush3.msra.mxu1 %v527_v39  ;;  %v533_v42 = vpop.eup %532 }
  0xf6   :  { %488 = vmatprep.subr.mxu1 %v582_v17  ;;  %v535_v43 = vpop.eup %534 }
  0xf7   :  { %489 = vmatpush3.msra.mxu1 %v529_v40  ;;  %v537_v44 = vpop.eup %536 }
  0xf8   :  { %490 = vmatprep.subr.mxu1 %v582_v17  ;;  %v539_v45 = vpop.eup %538 }
  0xf9   :  { %491 = vmatpush3.msra.mxu1 %v531_v41  ;;  %v541_v46 = vpop.eup %540 }
  0xfa   :  { %492 = vmatprep.subr.mxu1 %v582_v17  ;;  %v543_v47 = vpop.eup %542 }
  0xfb   :  { %493 = vmatpush3.msra.mxu1 %v533_v42  ;;  %v545_v48 = vpop.eup %544 }
  0xfc   :  { %494 = vmatprep.subr.mxu1 %v582_v17  ;;  %v547_v49 = vpop.eup %546 }
  0xfd   :  { %495 = vmatpush3.msra.mxu1 %v535_v43  ;;  %v549_v50 = vpop.eup %548 }
  0xfe   :  { %496 = vmatprep.subr.mxu1 %v582_v17  ;;  %v551_v52 = vpop.eup %550 }
  0xff   :  { %497 = vmatpush3.msra.mxu1 %v537_v44 }
 0x100   :  { %498 = vmatprep.subr.mxu1 %v582_v17 }
 0x101   :  { %499 = vmatpush3.msra.mxu1 %v539_v45 }
 0x102   :  { %500 = vmatprep.subr.mxu1 %v582_v17 }
 0x103   :  { %501 = vmatpush3.msra.mxu1 %v541_v46 }
 0x104   :  { %502 = vmatprep.subr.mxu1 %v582_v17 }
 0x105   :  { %503 = vmatpush3.msra.mxu1 %v543_v47 }
 0x106   :  { %504 = vmatprep.subr.mxu1 %v582_v17 }
 0x107   :  { %505 = vmatpush3.msra.mxu1 %v545_v48 }
 0x108   :  { %506 = vmatprep.subr.mxu1 %v582_v17 }
 0x109   :  { %507 = vmatpush3.msra.mxu1 %v547_v49 }
 0x10a   :  { %508 = vmatprep.subr.mxu1 %v582_v17 }
 0x10b   :  { %509 = vmatpush3.msra.mxu1 %v549_v50 }
 0x10c   :  { %510 = vmatprep.subr.mxu1 %v582_v17 }
 0x10d   :  { %511 = vmatpush3.msra.mxu1 %v551_v52 }
 0x10e   :  { %513 = vmatmul.mubr.f32.vlgmr.msra.gmra.mxu1 %v246_v51 }
 0x1ce   :  { %v319_v54 = vpop.f32.mrf.mxu1 }
 0x1cf   :  { %v701_v55 = vadd.f32 %v319_v54, %v251_v53 }
 0x1d0   :  { %v514_v56 = vpop.f32.mrf.mxu1 }
 0x1d1   :  { %v324_v57 = vsel %vm323_vm2, %v701_v55, -inf  ;;  %v385_v46 = vrot.slane %v701_v55, %v364_v31 }
 0x1d2   :  { %v325_v58 = vrot.slane %v324_v57, 4 }
 0x1d4   :  { %v326_v59 = vmax.f32 %v324_v57, %v325_v58 }
 0x1d6   :  { %v327_v60 = vrot.slane %v326_v59, 2 }
 0x1d8   :  { %v328_v61 = vmax.f32 %v326_v59, %v327_v60 }
 0x1da   :  { %v329_v62 = vrot.slane %v328_v61, 1 }
 0x1dc   :  { %v330_v63 = vmax.f32 %v328_v61, %v329_v62 }
 0x1de   :  { %v331_v0 = vsub.f32 %v701_v55, %v330_v63 }
 0x1e0   :  { %v332_v1 = vmul.f32 1.442695, %v331_v0 }
 0x1e2   :  { %552 = vpow2.f32 %v332_v1 }
 0x1ef   :  { %v553_v3 = vpop.eup %552 }
 0x1f0   :  { %v334_v4 = vmul.f32 %v553_v3, %v19_v2 }
 0x1f2   :  { %v335_v5 = vsel %vm323_vm2, %v334_v4, 0.0 }
 0x1f3   :  { %v336_v6 = vrot.slane %v335_v5, 4 }
 0x1f5   :  { %v337_v7 = vadd.f32 %v336_v6, %v335_v5 }
 0x1f7   :  { %v338_v8 = vrot.slane %v337_v7, 2 }
 0x1f9   :  { %v339_v9 = vadd.f32 %v338_v8, %v337_v7 }
 0x1fb   :  { %v340_v10 = vrot.slane %v339_v9, 1 }
 0x1fd   :  { %v341_v11 = vadd.f32 %v340_v10, %v339_v9 }
 0x1ff   :  { %554 = vrcp.f32 %v341_v11 }
 0x20c   :  { %v555_v12 = vpop.eup %554 }
 0x20d   :  { %v343_v13 = vmul.f32 %v555_v12, %v553_v3 }
 0x20f   :  { %v344_v14 = vsel %vm323_vm2, %v343_v13, -inf }
 0x210   :  { %v345_v15 = vrot.slane %v344_v14, 4 }
 0x212   :  { %v346_v16 = vmax.f32 %v344_v14, %v345_v15 }
 0x214   :  { %v347_v17 = vrot.slane %v346_v16, 2 }
 0x216   :  { %v348_v18 = vmax.f32 %v346_v16, %v347_v17 }
 0x218   :  { %v349_v19 = vrot.slane %v348_v18, 1 }
 0x21a   :  { %v350_v20 = vmax.f32 %v348_v18, %v349_v19 }
 0x21c   :  { %v419_v21 = vadd.f32 -1.0, %v350_v20  ;;  %v354_v25 = vsub.f32 %v350_v20, %v19_v2  ;;  %vm351_vm4 = vcmp.ge.f32.partialorder %v350_v20, %v19_v2 }
 0x21e   :  { %v356_v22 = vadd.f32 1e-06, %v419_v21 }
 0x220   :  { %556 = vrcp.f32 %v356_v22 }
 0x22d   :  { %v557_v26 = vpop.eup %556 }
 0x22e   :  { %v358_v28 = vmul.f32 %v557_v26, %v354_v25 }
 0x230   :  { %v359_v29 = vsel %vm351_vm4, %v358_v28, 0.0 }
 0x231   :  { %v360_v30 = vsel %vm353_vm3, 1.0, %v359_v29 }
 0x232   :  { %v361_v32 = vsub.f32 1.0, %v360_v30  ;;  %v370_v35 = vrot.slane %v360_v30, %v364_v31 }
 0x234   :  { %v365_v33 = vrot.slane %v361_v32, %v364_v31 }
 0x236   :  { %v366_v34 = vmul.f32 %v365_v33, %v343_v13 }
 0x238   :  { %v371_v36 = vadd.f32 %v370_v35, %v366_v34 }
 0x23a   :  { %v372_v37 = vmul.f32 %v371_v36, %v19_v2 }
 0x23c   :  { %v373_v38 = vsel %vm323_vm2, %v372_v37, 0.0 }
 0x23d   :  { %v374_v39 = vrot.slane %v373_v38, 4 }
 0x23f   :  { %v375_v40 = vadd.f32 %v374_v39, %v373_v38 }
 0x241   :  { %v376_v41 = vrot.slane %v375_v40, 2 }
 0x243   :  { %v377_v42 = vadd.f32 %v376_v41, %v375_v40 }
 0x245   :  { %v378_v43 = vrot.slane %v377_v42, 1 }
 0x247   :  { %v379_v44 = vadd.f32 %v378_v43, %v377_v42 }
 0x249   :  { %558 = vrcp.f32 %v379_v44 }
 0x256   :  { %v559_v45 = vpop.eup %558 }
 0x257   :  { %v381_v47 = vmul.f32 %v559_v45, %v372_v37 }
 0x259   :  { %v386_v48 = vsel %vm323_vm2, %v381_v47, %v385_v46 }
 0x25a   :  { %387 = vst [vmem:[#allocation2] sm:$0xff] %v386_v48 }
 0x25b   :  { %571 = shalt.err (!%p568_p4)
}
 0x25c   :  { %397 = dma.vmem_to_hbm [thread:$0]  %s395_s26, 128, %s721_s4, [#allocation3]  }
 0x25d   :  { %580 = dma.done.wait [#allocation3], 128  }
 0x25e   :  { %581 = vsyncadd [#allocation3], 4294967168 }
 0x25f   :  { %401 = vsyncpa [#allocation3], 1 }

</bundles_post_ra>
